<compile_context>
chip_gen: v7x
topology: tpu7x:2x2x1
jax: 0.10.0
libtpu: 0.0.40
codegen_flags: <defaults>
</compile_context>

<pallas_src>
import jax
import jax.numpy as jnp
from jax.experimental import pallas as pl
from jax.experimental.pallas import tpu as pltpu


def _make_identity_dma_kernel(row_chunks):
    """Build a kernel that DMA-copies `row_chunks` of a (rows, cols) HBM view."""

    single = len(row_chunks) == 1

    def kernel(x_hbm, o_hbm, sems):
        copies = []
        for idx, (start, size) in enumerate(row_chunks):
            if single:
                # One chunk covering the whole array: copy the full refs.
                src, dst = x_hbm, o_hbm
            else:
                # Static (start, size) slices -> contiguous byte ranges in HBM.
                src = x_hbm.at[pl.ds(start, size), :]
                dst = o_hbm.at[pl.ds(start, size), :]
            cp = pltpu.make_async_copy(src, dst, sems.at[idx])
            cp.start()
            copies.append(cp)
        # All chunks are in flight; now wait for completion.
        for cp in copies:
            cp.wait()

    return kernel


def _row_chunks(rows, n_chunks):
    """Split [0, rows) into <= n_chunks contiguous (start, size) pieces."""
    n_chunks = max(1, min(n_chunks, rows))
    base, rem = divmod(rows, n_chunks)
    chunks, start = [], 0
    for i in range(n_chunks):
        size = base + (1 if i < rem else 0)
        if size > 0:
            chunks.append((start, size))
            start += size
    return tuple(chunks)


def identity_quantizer(x, *, max_copies_in_flight=4, chunk_threshold_bytes=1 << 20):
    """Identity_Quantizer.forward(x) == x, via a Pallas HBM->HBM DMA copy kernel.

    Works for any shape/dtype.  No VMEM staging, no padding, exactly one HBM
    read + one HBM write.
    """
    if x.size == 0:
        return x  # nothing to copy

    total = int(x.size)
    itemsize = jnp.dtype(x.dtype).itemsize

    # Lane-dense 2-D HBM view: full-width 128-element rows when possible so DMA
    # chunk boundaries are clean contiguous byte ranges.  When x.size is not a
    # multiple of 128, fall back to a single contiguous (1, total) DMA (there is
    # no VMEM staging, so there is no lane-padding penalty either way).
    cols = 128 if total % 128 == 0 else total
    rows = total // cols
    # Row-major reshape of a contiguous HBM array is layout-only (no extra pass).
    x2 = x.reshape(rows, cols)

    total_bytes = total * itemsize
    n_chunks = 1 if total_bytes <= chunk_threshold_bytes else max_copies_in_flight
    chunks = _row_chunks(rows, n_chunks)

    out2 = pl.pallas_call(
        _make_identity_dma_kernel(chunks),
        out_shape=jax.ShapeDtypeStruct((rows, cols), x2.dtype),
        in_specs=[pl.BlockSpec(memory_space=pl.ANY)],   # raw HBM ref, no auto-DMA
        out_specs=pl.BlockSpec(memory_space=pl.ANY),    # raw HBM ref, written by DMA
        scratch_shapes=[pltpu.SemaphoreType.DMA((len(chunks),))],
    )(x2)

    return out2.reshape(x.shape)


if __name__ == "__main__":
    # NCHW activation-style input: batch=2, channels=4, spatial=16x16.
    x = jax.random.normal(jax.random.PRNGKey(0), (2, 4, 16, 16), dtype=jnp.float32)
    y = jax.block_until_ready(identity_quantizer(x))
    assert y.shape == x.shape
    assert y.dtype == x.dtype
    assert bool(jnp.array_equal(y, x))

    # Non-aligned shape + 16-bit dtype (size not a multiple of 128).
    x2 = jax.random.normal(jax.random.PRNGKey(1), (2, 3, 7, 5), dtype=jnp.bfloat16)
    y2 = jax.block_until_ready(identity_quantizer(x2))
    assert y2.shape == x2.shape
    assert y2.dtype == x2.dtype
    assert bool(jnp.array_equal(y2, x2))

    # Medium tensor (> 1 MiB) exercising the multi-DMA chunked path.
    x3 = jax.random.normal(jax.random.PRNGKey(2), (512, 1024), dtype=jnp.float32)
    y3 = jax.block_until_ready(identity_quantizer(x3))
    assert y3.shape == x3.shape
    assert y3.dtype == x3.dtype
    assert bool(jnp.array_equal(y3, x3))

    print("KERNEL_OK")
</pallas_src>

<mosaic_0001>
module attributes {stable_mosaic.version = 11 : i64} {
  func.func @kernel(%arg0: memref<16x128xf32, #tpu.memory_space<any>>, %arg1: memref<16x128xf32, #tpu.memory_space<any>>, %arg2: memref<1x!tpu.dma_semaphore, #tpu.memory_space<semaphore_mem>>) attributes {dimension_semantics = [], scalar_prefetch = 0 : i64, scratch_operands = 1 : i64, tpu.core_type = #tpu.core_type<tc>} {
    %c0_i32 = arith.constant 0 : i32
    %0 = tpu.memref_slice %arg2[%c0_i32] : memref<1x!tpu.dma_semaphore, #tpu.memory_space<semaphore_mem>> -> memref<1x!tpu.dma_semaphore, #tpu.memory_space<semaphore_mem>>
    %1 = tpu.memref_squeeze %0 : memref<1x!tpu.dma_semaphore, #tpu.memory_space<semaphore_mem>> -> memref<!tpu.dma_semaphore, #tpu.memory_space<semaphore_mem>>
    tpu.enqueue_dma source(%arg0 : memref<16x128xf32, #tpu.memory_space<any>>) target(%arg1 : memref<16x128xf32, #tpu.memory_space<any>>) target_semaphore(%1 : memref<!tpu.dma_semaphore, #tpu.memory_space<semaphore_mem>>)
    %c0_i32_0 = arith.constant 0 : i32
    %2 = tpu.memref_slice %arg2[%c0_i32_0] : memref<1x!tpu.dma_semaphore, #tpu.memory_space<semaphore_mem>> -> memref<1x!tpu.dma_semaphore, #tpu.memory_space<semaphore_mem>>
    %3 = tpu.memref_squeeze %2 : memref<1x!tpu.dma_semaphore, #tpu.memory_space<semaphore_mem>> -> memref<!tpu.dma_semaphore, #tpu.memory_space<semaphore_mem>>
    tpu.wait_dma2 semaphore(%3 : memref<!tpu.dma_semaphore, #tpu.memory_space<semaphore_mem>>) src(%arg0 : memref<16x128xf32, #tpu.memory_space<any>>) dst(%arg1 : memref<16x128xf32, #tpu.memory_space<any>>)
    return
  }
}

</mosaic_0001>

<bundles_post_ra>
// kernel: tpu_custom_call.1
= control target key start
LH: loop header
LB: loop body
LE: loop exit
PB: predicated region body
PF: predicated region fallthrough
CT: control target
= control target key end

     0   :  { %s34_s6 = smov [#allocation2]   ;;  %s35_s7 = smov [#allocation3]   ;;  %s53_s0 = inlined_call_operand.hbm [shape: f32[16,128], index: 0, kind: input, shape index: {}]   ;;  %s54_s1 = inlined_call_operand.hbm [shape: f32[16,128], index: 1, kind: output, shape index: {}]  }
   0x1   :  { %s36_s8 = smov 0  }
   0x2   :  { %18 = dma.general %s53_s0, 256, %s54_s1, %s34_s6, %s35_s7, [#allocation4], %s36_s8, 0  }
   0x3   :  { %32 = dma.done.wait [#allocation2], 256 }
   0x4   :  { %33 = vsyncadd [#allocation2], 4294967040 }
   0x5   :  { %22 = vsyncmov [#allocation2] }
   0x8   :  { %s23_s13 = vpop.sfrf %22 }
   0x9   :  { %p28_p0 = scmp.ne.s32.totalorder %s23_s13, 0 }
   0xb   :  { %27 = shalt.err (%p28_p0)  }

</bundles_post_ra>
